<compile_context>
chip_gen: v7x
topology: tpu7x:2x2x1
jax: 0.10.0
libtpu: 0.0.40
codegen_flags: <defaults>
</compile_context>

<pallas_src>
import math

import jax
import jax.numpy as jnp
from jax.experimental import pallas as pl
from jax.experimental.pallas import tpu as pltpu


def _round_up(x: int, m: int) -> int:
    return ((x + m - 1) // m) * m


def _vmem_caps():
    """(tile byte budget, vmem_limit_bytes) derived from this chip's VMEM."""
    try:
        cap = int(pltpu.get_tpu_info().vmem_capacity_bytes)
    except Exception:  # not on TPU / API unavailable -> conservative v7x numbers
        cap = 64 * 1024 * 1024
    budget = int(cap * 0.55)          # what we let the tiles use
    limit = int(cap * 0.75)           # scoped VMEM limit handed to Mosaic
    return budget, limit


# --------------------------------------------------------------------------
# Kernels
# --------------------------------------------------------------------------
def _td_linear_resident_kernel(x_ref, w_ref, b_ref, o_ref):
    # x_ref: (tm, F)  w_ref: (F, Hp) resident  b_ref: (1, Hp) f32  o_ref: (tm, Hp)
    acc = jnp.dot(x_ref[...], w_ref[...], preferred_element_type=jnp.float32)
    o_ref[...] = (acc + b_ref[...]).astype(o_ref.dtype)


def _td_linear_tiled_kernel_f32out(x_ref, w_ref, b_ref, o_ref):
    # f32 output: accumulate directly into the resident o_ref tile (no scratch).
    k = pl.program_id(2)

    @pl.when(k == 0)
    def _():
        o_ref[...] = jnp.broadcast_to(b_ref[...], o_ref.shape)

    o_ref[...] += jnp.dot(x_ref[...], w_ref[...],
                          preferred_element_type=jnp.float32)


def _td_linear_tiled_kernel(x_ref, w_ref, b_ref, o_ref, acc_ref):
    # Generic output dtype: f32 VMEM accumulator scratch, cast at the last k.
    k = pl.program_id(2)

    @pl.when(k == 0)
    def _():
        acc_ref[...] = jnp.zeros_like(acc_ref)

    acc_ref[...] += jnp.dot(x_ref[...], w_ref[...],
                            preferred_element_type=jnp.float32)

    @pl.when(k == pl.num_programs(2) - 1)
    def _():
        o_ref[...] = (acc_ref[...] + b_ref[...]).astype(o_ref.dtype)


# --------------------------------------------------------------------------
# Wrapper
# --------------------------------------------------------------------------
def time_distributed_linear(x, weight, bias, *, compute_dtype=None,
                            tm=512, tn=512, tk=2048, force_tiled=False):
    """TimeDistributed(nn.Linear) forward.

    x:      (B, T, ..., F)  rank > 2; Linear applied to the last dim
    weight: (H, F)          PyTorch nn.Linear layout
    bias:   (H,)
    returns (B, T, ..., H)  in x.dtype
    """
    assert x.ndim > 2, "TimeDistributed expects input of rank > 2"
    lead = x.shape[:-1]
    F = int(x.shape[-1])
    H, F_w = int(weight.shape[0]), int(weight.shape[1])
    assert F_w == F

    out_dtype = x.dtype
    # bf16 MXU feed by default for f32 inputs; accumulation stays f32 in-kernel.
    if compute_dtype is None:
        compute_dtype = jnp.bfloat16 if x.dtype == jnp.float32 else x.dtype
    x = x.astype(compute_dtype)
    w_t = weight.T.astype(compute_dtype)            # (F, H): K-major, no per-tile vxpose
    b2d = bias.astype(jnp.float32).reshape(1, H)

    M = 1
    for d in lead:
        M *= int(d)
    x_flat = x.reshape(M, F)

    in_bytes = jnp.dtype(compute_dtype).itemsize
    o_bytes = jnp.dtype(out_dtype).itemsize
    row_align = 32 if in_bytes == 1 else (16 if in_bytes == 2 else 8)

    # Lane-dense output: pad H (weight/bias only -- cheap) to a 128 multiple.
    H_pad = _round_up(H, 128)
    if H_pad != H:
        w_t = jnp.pad(w_t, ((0, 0), (0, H_pad - H)))
        b2d = jnp.pad(b2d, ((0, 0), (0, H_pad - H)))

    budget, vmem_limit = _vmem_caps()
    w_bytes = F * H_pad * in_bytes
    b_bytes = H_pad * 4

    # ---------------- resident-weight fast path ----------------
    def resident_fits(tm_try):
        x_tile = tm_try * F * in_bytes
        o_tile = tm_try * H_pad * o_bytes
        return w_bytes + b_bytes + 2 * x_tile + 2 * o_tile <= budget

    tm_res = M if M <= tm else tm
    while tm_res > row_align and not resident_fits(tm_res):
        tm_res = max(row_align, _round_up(tm_res // 2, row_align))

    if (not force_tiled) and resident_fits(tm_res):
        grid_m = pl.cdiv(M, tm_res)
        # v7x megacore: make sure both TensorCores get an M tile when there is
        # enough work for a split.
        if grid_m == 1 and M > 2 * row_align:
            tm_half = _round_up(pl.cdiv(M, 2), row_align)
            if resident_fits(tm_half):
                tm_res = tm_half
                grid_m = pl.cdiv(M, tm_res)

        cost = pl.CostEstimate(
            flops=2 * M * H_pad * F,
            transcendentals=0,
            bytes_accessed=(M * F * in_bytes + w_bytes + b_bytes
                            + M * H_pad * o_bytes),
        )
        out_flat = pl.pallas_call(
            _td_linear_resident_kernel,
            out_shape=jax.ShapeDtypeStruct((M, H_pad), out_dtype),
            grid_spec=pltpu.PrefetchScalarGridSpec(
                num_scalar_prefetch=0,
                grid=(grid_m,),
                in_specs=[
                    pl.BlockSpec((tm_res, F), lambda i: (i, 0)),      # x tile
                    pl.BlockSpec((F, H_pad), lambda i: (0, 0)),       # resident weight
                    pl.BlockSpec((1, H_pad), lambda i: (0, 0)),       # bias
                ],
                out_specs=pl.BlockSpec((tm_res, H_pad), lambda i: (i, 0)),
            ),
            compiler_params=pltpu.CompilerParams(
                dimension_semantics=("parallel",),
                vmem_limit_bytes=vmem_limit,
            ),
            cost_estimate=cost,
        )(x_flat, w_t, b2d)

        out = out_flat[:, :H] if H_pad != H else out_flat
        return out.reshape(*lead, H)

    # ---------------- tiled (M, N, K) fallback ----------------
    # Zero-pad F (the reduction dim) to a 128 multiple -- required for a correct
    # K reduction; M is NOT padded (partial last M tile via cdiv grid).
    F_pad = _round_up(F, 128)
    if F_pad != F:
        x_flat = jnp.pad(x_flat, ((0, 0), (0, F_pad - F)))
        w_t = jnp.pad(w_t, ((0, F_pad - F), (0, 0)))

    def _pick_tile(default, padded):
        t = min(default, padded)
        t = max(128, (t // 128) * 128)
        while padded % t != 0:
            t -= 128
        return t

    tk_t = _pick_tile(tk, F_pad)
    tn_t = _pick_tile(tn, H_pad)
    tm_t = M if M <= tm else tm

    use_scratch = out_dtype != jnp.float32

    def tiled_bytes(tm_, tn_, tk_):
        x_tile = tm_ * tk_ * in_bytes
        w_tile = tk_ * tn_ * in_bytes
        o_tile = tm_ * tn_ * o_bytes
        acc = tm_ * tn_ * 4 if use_scratch else 0
        return 2 * (x_tile + w_tile + o_tile) + acc + b_bytes

    while tiled_bytes(tm_t, tn_t, tk_t) > budget and tk_t > 128:
        tk_t = _pick_tile(tk_t // 2, F_pad)
    while tiled_bytes(tm_t, tn_t, tk_t) > budget and tn_t > 128:
        tn_t = _pick_tile(tn_t // 2, H_pad)
    while tiled_bytes(tm_t, tn_t, tk_t) > budget and tm_t > row_align:
        tm_t = max(row_align, _round_up(tm_t // 2, row_align))

    grid = (pl.cdiv(M, tm_t), H_pad // tn_t, F_pad // tk_t)

    if use_scratch:
        kernel = _td_linear_tiled_kernel
        scratch = [pltpu.VMEM((tm_t, tn_t), jnp.float32)]
    else:
        kernel = _td_linear_tiled_kernel_f32out
        scratch = []

    cost = pl.CostEstimate(
        flops=2 * M * H_pad * F_pad,
        transcendentals=0,
        bytes_accessed=(M * F_pad * in_bytes
                        + grid[0] * F_pad * H_pad * in_bytes   # weight re-streams per M pass
                        + M * H_pad * o_bytes),
    )

    out_flat = pl.pallas_call(
        kernel,
        out_shape=jax.ShapeDtypeStruct((M, H_pad), out_dtype),
        grid_spec=pltpu.PrefetchScalarGridSpec(
            num_scalar_prefetch=0,
            grid=grid,
            in_specs=[
                pl.BlockSpec((tm_t, tk_t), lambda i, j, k: (i, k)),   # x tile
                pl.BlockSpec((tk_t, tn_t), lambda i, j, k: (k, j)),   # (F, H) weight tile
                pl.BlockSpec((1, tn_t), lambda i, j, k: (0, j)),      # bias tile
            ],
            out_specs=pl.BlockSpec((tm_t, tn_t), lambda i, j, k: (i, j)),
            scratch_shapes=scratch,
        ),
        compiler_params=pltpu.CompilerParams(
            dimension_semantics=("parallel", "parallel", "arbitrary"),
            vmem_limit_bytes=vmem_limit,
        ),
        cost_estimate=cost,
    )(x_flat, w_t, b2d)

    out = out_flat[:, :H] if H_pad != H else out_flat
    return out.reshape(*lead, H)


# --------------------------------------------------------------------------
# Demo / self-test
# --------------------------------------------------------------------------
if __name__ == "__main__":
    # Small shapes consistent with the module's forward: (batch, time, features)
    B, T, F, H = 2, 8, 32, 32

    key = jax.random.PRNGKey(0)
    kx, kw, kb = jax.random.split(key, 3)

    x = jax.random.normal(kx, (B, T, F), dtype=jnp.float32)
    bound = 1.0 / math.sqrt(F)
    weight = jax.random.uniform(kw, (H, F), minval=-bound, maxval=bound,
                                dtype=jnp.float32)
    bias = jax.random.uniform(kb, (H,), minval=-bound, maxval=bound,
                              dtype=jnp.float32)

    # Reference: TimeDistributed(nn.Linear) semantics in plain JAX.
    ref = (x.reshape(B * T, F) @ weight.T + bias).reshape(B, T, H)

    # Default path: bf16 MXU feed + f32 accumulation, resident-weight kernel.
    out = jax.block_until_ready(time_distributed_linear(x, weight, bias))
    assert out.shape == (B, T, H)
    assert out.dtype == x.dtype
    assert jnp.allclose(out, ref, atol=5e-2, rtol=5e-2)

    # Explicit f32 feed for strict parity with the float32 reference.
    out_f32 = jax.block_until_ready(
        time_distributed_linear(x, weight, bias, compute_dtype=jnp.float32))
    assert jnp.allclose(out_f32, ref, atol=1e-5, rtol=1e-5)

    # Exercise the tiled (M, N, K) fallback path as well (correctness check).
    out_tiled = jax.block_until_ready(
        time_distributed_linear(x, weight, bias, force_tiled=True))
    assert jnp.allclose(out_tiled, ref, atol=5e-2, rtol=5e-2)

    print("KERNEL_OK")
</pallas_src>

<mosaic_0001>
module attributes {stable_mosaic.version = 11 : i64} {
  func.func @_td_linear_resident_kernel(%arg0: i32, %arg1: memref<16x32xbf16, #tpu.memory_space<vmem>>, %arg2: memref<32x128xbf16, #tpu.memory_space<vmem>>, %arg3: memref<1x128xf32, #tpu.memory_space<vmem>>, %arg4: memref<16x128xf32, #tpu.memory_space<vmem>>) attributes {dimension_semantics = [#tpu.dimension_semantics<parallel>], iteration_bounds = array<i64: 1>, scalar_prefetch = 0 : i64, scratch_operands = 0 : i64, tpu.core_type = #tpu.core_type<tc>, window_params = [{transform_indices = @transform_0, window_bounds = array<i64: 16, 32>}, {pipeline_mode = #tpu.pipeline_mode<synchronous>, transform_indices = @transform_1, window_bounds = array<i64: 32, 128>}, {pipeline_mode = #tpu.pipeline_mode<synchronous>, transform_indices = @transform_2, window_bounds = array<i64: 1, 128>}, {transform_indices = @transform_3, window_bounds = array<i64: 16, 128>}]} {
    %c0 = arith.constant 0 : index
    %c0_0 = arith.constant 0 : index
    %0 = vector.load %arg1[%c0, %c0_0] : memref<16x32xbf16, #tpu.memory_space<vmem>>, vector<16x32xbf16>
    %c0_1 = arith.constant 0 : index
    %c0_2 = arith.constant 0 : index
    %1 = vector.load %arg2[%c0_1, %c0_2] : memref<32x128xbf16, #tpu.memory_space<vmem>>, vector<32x128xbf16>
    %cst = arith.constant dense<0.000000e+00> : vector<16x128xf32>
    %2 = tpu.matmul %0, %1, %cst {dimension_numbers = #tpu.dot_dimension_numbers<[1], [0], [0], [1], [0, 0, 1, 1], [], []>} : vector<16x32xbf16>, vector<32x128xbf16>, vector<16x128xf32> -> vector<16x128xf32>
    %c0_3 = arith.constant 0 : index
    %c0_4 = arith.constant 0 : index
    %3 = vector.load %arg3[%c0_3, %c0_4] : memref<1x128xf32, #tpu.memory_space<vmem>>, vector<1x128xf32>
    %4 = vector.broadcast %3 : vector<1x128xf32> to vector<16x128xf32>
    %5 = arith.addf %2, %4 : vector<16x128xf32>
    %c0_5 = arith.constant 0 : index
    %c0_6 = arith.constant 0 : index
    %6 = vector.load %arg4[%c0_5, %c0_6] : memref<16x128xf32, #tpu.memory_space<vmem>>, vector<16x128xf32>
    tpu.vector_store %arg4[%c0_5, %c0_6], %5 {strides = array<i32>} : memref<16x128xf32, #tpu.memory_space<vmem>>, vector<16x128xf32>,
    return
  }
  func.func @transform_0(%arg0: i32) -> (i32, i32) {
    %c0_i32 = arith.constant 0 : i32
    %c0_i32_0 = arith.constant 0 : i32
    return %arg0, %c0_i32 : i32, i32
  }
  func.func @transform_1(%arg0: i32) -> (i32, i32) {
    %c0_i32 = arith.constant 0 : i32
    %c0_i32_0 = arith.constant 0 : i32
    %c0_i32_1 = arith.constant 0 : i32
    return %c0_i32, %c0_i32_0 : i32, i32
  }
  func.func @transform_2(%arg0: i32) -> (i32, i32) {
    %c0_i32 = arith.constant 0 : i32
    %c0_i32_0 = arith.constant 0 : i32
    %c0_i32_1 = arith.constant 0 : i32
    return %c0_i32, %c0_i32_0 : i32, i32
  }
  func.func @transform_3(%arg0: i32) -> (i32, i32) {
    %c0_i32 = arith.constant 0 : i32
    %c0_i32_0 = arith.constant 0 : i32
    return %arg0, %c0_i32 : i32, i32
  }
}

</mosaic_0001>

<bundles_post_ra>
// kernel: tpu_custom_call.1
= control target key start
LH: loop header
LB: loop body
LE: loop exit
PB: predicated region body
PF: predicated region fallthrough
CT: control target
= control target key end

     0   :  { %8 = vsyncpa [#allocation3], 0  ;;  %s307_s0 = inlined_call_operand.hbm [shape: bf16[16,32], index: 0, kind: input, shape index: {}]   ;;  %s308_s1 = inlined_call_operand.hbm [shape: bf16[32,128], index: 1, kind: input, shape index: {}]   ;;  %s309_s2 = inlined_call_operand.vmem [shape: f32[1,128], index: 2, kind: input, shape index: {}]   ;;  %s310_s3 = inlined_call_operand.hbm [shape: f32[16,128], index: 3, kind: output, shape index: {}]  }
   0x1   :  { %9 = vsyncpa [#allocation6], 0 }
   0x2   :  { %10 = vsyncpa [#allocation4], 0  ;;  %s239_s12 = smov [#allocation2]   ;;  %s167_s16 = scalar_lea.hbm %s307_s0, 128 }
   0x3   :  { %s16_s13 = sshll.u32 %s239_s12, 4  ;;  %p168_p0 = scmp.ne.s32.totalorder %s307_s0, %s167_s16  ;;  %s17_s13 = int_to_ptr.vmem [resolvable:$true] %s16_s13 }
   0x4   :  { %p171_p1 = scmp.lt.u32.totalorder %s167_s16, %s307_s0 }
   0x6   :  { %p173_p2 = pnand %p171_p1, %p168_p0 }
   0x8   :  { %176 = shalt.err (!%p173_p2)
}
   0x9   :  { %s177_s21 = scalar_lea.vmem %s17_s13, 128  ;;  %p182_p4 = scmp.lt.s32.totalorder %s17_s13, %s17_s13 }
   0xa   :  { %p178_p3 = scmp.ne.s32.totalorder %s17_s13, %s177_s21  ;;  %p183_p5 = scmp.lt.s32.totalorder %s177_s21, %s177_s21 }
   0xc   :  { %p184_p6 = por %p183_p5, %p182_p4 }
   0xe   :  { %p185_p7 = pnand %p184_p6, %p178_p3 }
  0x10   :  { %188 = shalt.err (!%p185_p7)
}
  0x11   :  { %s240_s22 = smov 64   ;;  %s241_s23 = smov 4  }
  0x12   :  { %22 = dma.hbm_to_vmem [thread:$0]  %s307_s0, 128, %s17_s13, [#allocation3], %s240_s22, %s240_s22, %s241_s23  }
  0x13   :  { %s242_s26 = smov [#allocation5]   ;;  %s189_s30 = scalar_lea.hbm %s308_s1, 256 }
  0x14   :  { %s28_s27 = sshll.u32 %s242_s26, 4  ;;  %p190_p8 = scmp.ne.s32.totalorder %s308_s1, %s189_s30  ;;  %s29_s27 = int_to_ptr.vmem [resolvable:$true] %s28_s27 }
  0x15   :  { %p193_p9 = scmp.lt.u32.totalorder %s189_s30, %s308_s1 }
  0x17   :  { %p195_p10 = pnand %p193_p9, %p190_p8 }
  0x19   :  { %198 = shalt.err (!%p195_p10)
}
  0x1a   :  { %s199_s8 = scalar_lea.vmem %s29_s27, 256  ;;  %p204_p12 = scmp.lt.s32.totalorder %s29_s27, %s29_s27 }
  0x1b   :  { %p200_p11 = scmp.ne.s32.totalorder %s29_s27, %s199_s8  ;;  %p205_p13 = scmp.lt.s32.totalorder %s199_s8, %s199_s8 }
  0x1d   :  { %p206_p0 = por %p205_p13, %p204_p12 }
  0x1f   :  { %p207_p1 = pnand %p206_p0, %p200_p11 }
  0x21   :  { %210 = shalt.err (!%p207_p1)
}
  0x22   :  { %34 = dma.hbm_to_vmem [thread:$0]  %s308_s1, 256, %s29_s27, [#allocation6], %s240_s22, %s240_s22, %s241_s23  }
  0x23   :  { %233 = dma.done.wait [#allocation3], 128  }
  0x24   :  { %234 = vsyncadd [#allocation3], 4294967168 }
  0x25   :  { %235 = dma.done.wait [#allocation6], 256  }
  0x26   :  { %236 = vsyncadd [#allocation6], 4294967040  ;;  %v243_v0 = vmov 0.0   ;;  %vm244_vm0 = vmmov 0   ;;  %v164_v1 = vld [vmem:[#allocation5] sm:$0xff]   ;;  %v165_v2 = vld [vmem:[#allocation5 + $0x8] sm:$0xff]  }
  0x27   :  { %147 = vmatprep.subr.bf16.mxu0 %v243_v0  ;;  %151 = vmatprep.mubr.msk.bf16.mxu0 %vm244_vm0, %v243_v0  ;;  %v166_v3 = vld [vmem:[#allocation2] sm:$0xff]   ;;  %vm74_vm1 = vcmask 261120   ;;  %s245_s1 = smov [#allocation7]  }
  0x28   :  { %148 = vmatpush3.bf16.msra.mxu0 %v164_v1  ;;  %v139_v4 = vld [vmem:[%s309_s2] ss:$0 sm:$0xff]  ;;  %s126_s12 = sshll.u32 %s245_s1, 4  ;;  %s127_s12 = int_to_ptr.vmem [resolvable:$true] %s126_s12 }
  0x29   :  { %149 = vmatprep.subr.bf16.mxu0 %v243_v0  ;;  %s211_s13 = scalar_lea.vmem %s127_s12, 256  ;;  %p216_p3 = scmp.lt.s32.totalorder %s127_s12, %s127_s12 }
  0x2a   :  { %p212_p2 = scmp.ne.s32.totalorder %s127_s12, %s211_s13  ;;  %p217_p4 = scmp.lt.s32.totalorder %s211_s13, %s211_s13 }
  0x2c   :  { %150 = vmatpush3.bf16.msra.mxu0 %v165_v2  ;;  %p218_p5 = por %p217_p4, %p216_p3 }
  0x2e   :  { %p219_p6 = pnand %p218_p5, %p212_p2 }
  0x2f   :  { %152 = vmatmul.mubr.msk.bf16.vlgmr.msra.gmra.mrb[0].mxu0 %vm74_vm1, %v166_v3 }
 0x102   :  { %v112_v5 = vpop.f32.mrb[0].mxu0 }
 0x103   :  { %v113_v6 = vadd.f32 %v139_v4, %v112_v5  ;;  %v153_v7 = vpop.f32.mrb[1].mxu0 }
 0x104   :  { %v115_v8 = vpop.f32.mrb[2].mxu0 }
 0x105   :  { %119 = vst [vmem:[#allocation7] sm:$0xff] %v113_v6  ;;  %v116_v9 = vadd.f32 %v139_v4, %v115_v8  ;;  %v154_v10 = vpop.f32.mrb[3].mxu0 }
 0x107   :  { %120 = vst [vmem:[#allocation7 + $0x8] sm:$0xff] %v116_v9 }
 0x108   :  { %222 = shalt.err (!%p219_p6)
}
 0x109   :  { %s223_s15 = scalar_lea.hbm %s310_s3, 256 }
 0x10a   :  { %p224_p7 = scmp.ne.s32.totalorder %s310_s3, %s223_s15  ;;  %p227_p8 = scmp.lt.u32.totalorder %s223_s15, %s310_s3 }
 0x10c   :  { %p229_p9 = pnand %p227_p8, %p224_p7 }
 0x10e   :  { %232 = shalt.err (!%p229_p9)
}
 0x10f   :  { %s246_s20 = smov 128   ;;  %s247_s21 = smov 8  }
 0x110   :  { %132 = dma.vmem_to_hbm [thread:$0]  %s127_s12, 256, %s310_s3, [#allocation4], %s246_s20, %s246_s20, %s247_s21  }
 0x111   :  { %237 = dma.done.wait [#allocation4], 256  }
 0x112   :  { %238 = vsyncadd [#allocation4], 4294967040 }
 0x113   :  { %136 = vsyncpa [#allocation3], 1 }
 0x114   :  { %137 = vsyncpa [#allocation6], 1 }
 0x115   :  { %138 = vsyncpa [#allocation4], 1 }

</bundles_post_ra>
